<compile_context>
chip_gen: v5e
topology: v5e:2x2
jax: 0.10.0
libtpu: 0.0.40
codegen_flags: <defaults>
</compile_context>

<pallas_src>
import jax
import jax.numpy as jnp
from jax.experimental import pallas as pl
from jax.experimental.pallas import tpu as pltpu

_LANES = 128
_ACC_SUBLANES = 8           # accumulator vreg shape (8, 128)
_MAX_TILE_ROWS = 1024       # 512 KiB f32 / 256 KiB bf16 per block
_NUM_SPLITS = 2             # partial sums (one per TensorCore on v7x)


def _round_up(v, m):
    return ((v + m - 1) // m) * m


def _cdiv(a, b):
    return -(-a // b)


def _sublane_multiple(dtype):
    # f32 -> 8, bf16/f16 -> 16, int8/fp8 -> 32 (packing-aware block rows).
    itemsize = jnp.dtype(dtype).itemsize
    return _ACC_SUBLANES * max(1, 4 // itemsize)


def _make_sumexp_kernel(tile_rows, steps, rows, needs_mask):
    """Kernel over grid (num_splits, steps): per-split partial sum of exp."""

    def kernel(x_ref, o_ref, acc_ref):
        c = pl.program_id(0)   # split (parallel)
        i = pl.program_id(1)   # streaming step within the split (arbitrary)

        @pl.when(i == 0)
        def _init():
            acc_ref[...] = jnp.zeros_like(acc_ref)

        xv = x_ref[...].astype(jnp.float32)
        if needs_mask:
            # Static row bound: rows beyond the real array (partial / clamped
            # blocks) are forced to -inf so exp contributes exactly 0.
            row0 = (c * steps + i) * tile_rows
            rid = row0 + jax.lax.broadcasted_iota(
                jnp.int32, (tile_rows, _LANES), 0
            )
            xv = jnp.where(rid < rows, xv, -jnp.inf)

        e = jnp.exp(xv)
        # Leading-axis sum -> plain VPU vreg adds into the (8,128) accumulator.
        acc_ref[...] += jnp.sum(
            e.reshape(tile_rows // _ACC_SUBLANES, _ACC_SUBLANES, _LANES), axis=0
        )

        @pl.when(i == steps - 1)
        def _finalize():
            # One cross-sublane reduce per split; lane-dense (1, 128) output.
            o_ref[...] = jnp.sum(acc_ref[...], axis=0, keepdims=True)

    return kernel


def block_forward(x, *, max_tile_rows=_MAX_TILE_ROWS, num_splits=_NUM_SPLITS):
    """JAX/Pallas equivalent of Block().forward(x). Returns a scalar."""
    x = jnp.asarray(x)
    flat = x.reshape(-1)
    n = flat.shape[0]
    n_main = (n // _LANES) * _LANES

    # Tail (< 128 elements): negligible, done in plain JAX (avoids any pad).
    tail_sum = jnp.sum(jnp.exp(flat[n_main:].astype(jnp.float32)))

    if n_main == 0:
        total = tail_sum
    else:
        x2d = flat[:n_main].reshape(-1, _LANES)  # bitcast when n is lane-aligned
        rows = n_main // _LANES

        sub = _sublane_multiple(x.dtype)
        tile_rows = min(max_tile_rows, _round_up(rows, sub))
        rb = _cdiv(rows, tile_rows)               # row blocks
        ns = max(1, min(num_splits, rb))          # partial-sum splits
        steps = _cdiv(rb, ns)
        needs_mask = (ns * steps * tile_rows) != rows

        def in_map(c, i):
            blk = c * steps + i
            # Clamp so a (masked-out) trailing block never indexes past the
            # array; its contribution is zeroed by the in-kernel mask.
            return (jnp.minimum(blk, rb - 1), 0)

        partials = pl.pallas_call(
            _make_sumexp_kernel(tile_rows, steps, rows, needs_mask),
            out_shape=jax.ShapeDtypeStruct((ns, _LANES), jnp.float32),
            grid_spec=pltpu.PrefetchScalarGridSpec(
                num_scalar_prefetch=0,
                grid=(ns, steps),
                in_specs=[pl.BlockSpec((tile_rows, _LANES), in_map)],
                out_specs=pl.BlockSpec((1, _LANES), lambda c, i: (c, 0)),
                scratch_shapes=[pltpu.VMEM((_ACC_SUBLANES, _LANES), jnp.float32)],
            ),
            compiler_params=pltpu.CompilerParams(
                dimension_semantics=("parallel", "arbitrary"),
            ),
        )(x2d)

        total = jnp.sum(partials, dtype=jnp.float32) + tail_sum

    return 1.0 - 1.0 / (total + 1.0)


if __name__ == "__main__":
    key = jax.random.PRNGKey(0)
    # Small NCHW conv-style input.
    x = jax.random.normal(key, (2, 4, 16, 16), dtype=jnp.float32)

    y = block_forward(x)
    y = jax.block_until_ready(y)

    # Reference check in plain JAX (same math as the PyTorch module).
    ref = 1.0 - 1.0 / (jnp.sum(jnp.exp(x)) + 1.0)
    assert jnp.allclose(y, ref, rtol=1e-5, atol=1e-6), (y, ref)

    print("KERNEL_OK")
</pallas_src>

<mosaic_0001>
module attributes {stable_mosaic.version = 11 : i64} {
  func.func @kernel(%arg0: i32, %arg1: i32, %arg2: memref<16x128xf32, #tpu.memory_space<vmem>>, %arg3: memref<1x128xf32, #tpu.memory_space<vmem>>, %arg4: memref<8x128xf32, #tpu.memory_space<vmem>>) attributes {dimension_semantics = [#tpu.dimension_semantics<parallel>, #tpu.dimension_semantics<arbitrary>], iteration_bounds = array<i64: 1, 1>, scalar_prefetch = 0 : i64, scratch_operands = 1 : i64, tpu.core_type = #tpu.core_type<tc>, window_params = [{transform_indices = @transform_0, window_bounds = array<i64: 16, 128>}, {transform_indices = @transform_1, window_bounds = array<i64: 1, 128>}]} {
    %c0_i32 = arith.constant 0 : i32
    %0 = arith.cmpi eq, %arg1, %c0_i32 : i32
    %1 = arith.extui %0 : i1 to i32
    %c0_i32_0 = arith.constant 0 : i32
    %2 = arith.cmpi ne, %1, %c0_i32_0 : i32
    scf.if %2 {
      %cst_8 = arith.constant 0.000000e+00 : f32
      %13 = vector.broadcast %cst_8 : f32 to vector<8x128xf32>
      %c0_9 = arith.constant 0 : index
      %c0_10 = arith.constant 0 : index
      %14 = vector.load %arg4[%c0_9, %c0_10] : memref<8x128xf32, #tpu.memory_space<vmem>>, vector<8x128xf32>
      tpu.vector_store %arg4[%c0_9, %c0_10], %13 {strides = array<i32>} : memref<8x128xf32, #tpu.memory_space<vmem>>, vector<8x128xf32>,
    } else {
    }
    %c0 = arith.constant 0 : index
    %c0_1 = arith.constant 0 : index
    %3 = vector.load %arg2[%c0, %c0_1] : memref<16x128xf32, #tpu.memory_space<vmem>>, vector<16x128xf32>
    %4 = math.exp %3 : vector<16x128xf32>
    %c0_2 = arith.constant 0 : index
    %c0_3 = arith.constant 0 : index
    %5 = vector.load %arg4[%c0_2, %c0_3] : memref<8x128xf32, #tpu.memory_space<vmem>>, vector<8x128xf32>
    %6 = vector.shape_cast %4 : vector<16x128xf32> to vector<2x8x128xf32>
    %cst = arith.constant dense<0.000000e+00> : vector<8x128xf32>
    %7 = vector.multi_reduction <add>, %6, %cst [0] : vector<2x8x128xf32> to vector<8x128xf32>
    %8 = arith.addf %5, %7 : vector<8x128xf32>
    %c0_4 = arith.constant 0 : index
    %c0_5 = arith.constant 0 : index
    %9 = vector.load %arg4[%c0_4, %c0_5] : memref<8x128xf32, #tpu.memory_space<vmem>>, vector<8x128xf32>
    tpu.vector_store %arg4[%c0_4, %c0_5], %8 {strides = array<i32>} : memref<8x128xf32, #tpu.memory_space<vmem>>, vector<8x128xf32>,
    %c0_i32_6 = arith.constant 0 : i32
    %10 = arith.cmpi eq, %arg1, %c0_i32_6 : i32
    %11 = arith.extui %10 : i1 to i32
    %c0_i32_7 = arith.constant 0 : i32
    %12 = arith.cmpi ne, %11, %c0_i32_7 : i32
    scf.if %12 {
      %c0_8 = arith.constant 0 : index
      %c0_9 = arith.constant 0 : index
      %13 = vector.load %arg4[%c0_8, %c0_9] : memref<8x128xf32, #tpu.memory_space<vmem>>, vector<8x128xf32>
      %cst_10 = arith.constant dense<0.000000e+00> : vector<128xf32>
      %14 = vector.multi_reduction <add>, %13, %cst_10 [0] : vector<8x128xf32> to vector<128xf32>
      %15 = vector.shape_cast %14 : vector<128xf32> to vector<1x128xf32>
      %c0_11 = arith.constant 0 : index
      %c0_12 = arith.constant 0 : index
      %16 = vector.load %arg3[%c0_11, %c0_12] : memref<1x128xf32, #tpu.memory_space<vmem>>, vector<1x128xf32>
      tpu.vector_store %arg3[%c0_11, %c0_12], %15 {strides = array<i32>} : memref<1x128xf32, #tpu.memory_space<vmem>>, vector<1x128xf32>,
    } else {
    }
    return
  }
  func.func @transform_0(%arg0: i32, %arg1: i32) -> (i32, i32) {
    %c1_i32 = arith.constant 1 : i32
    %0 = arith.muli %arg0, %c1_i32 : i32
    %1 = arith.addi %0, %arg1 : i32
    %c0_i32 = arith.constant 0 : i32
    %2 = arith.minsi %1, %c0_i32 : i32
    %c0_i32_0 = arith.constant 0 : i32
    %c0_i32_1 = arith.constant 0 : i32
    return %2, %c0_i32_0 : i32, i32
  }
  func.func @transform_1(%arg0: i32, %arg1: i32) -> (i32, i32) {
    %c0_i32 = arith.constant 0 : i32
    %c0_i32_0 = arith.constant 0 : i32
    return %arg0, %c0_i32 : i32, i32
  }
}

</mosaic_0001>

<bundles_post_ra>
// kernel: tpu_custom_call.1
= control target key start
LH: loop header
LB: loop body
LE: loop exit
PB: predicated region body
PF: predicated region fallthrough
CT: control target
= control target key end

     0   :  { %6 = vsyncpa [#allocation4], 0  ;;  %s160_s0 = inlined_call_operand.hbm [shape: f32[16,128], index: 0, kind: input, shape index: {}]   ;;  %s161_s1 = inlined_call_operand.hbm [shape: f32[1,128], index: 1, kind: output, shape index: {}]  }
   0x1   :  { %7 = vsyncpa [#allocation5], 0  ;;  %s18_s8 = sshll.u32 %s160_s0, 4  ;;  %s140_s9 = smov [#allocation3]   ;;  %s19_s8 = int_to_ptr.hbm [resolvable:$true] %s18_s8 }
   0x2   :  { %s20_s10 = sshll.u32 %s140_s9, 4  ;;  %s141_s11 = smov 128   ;;  %s21_s10 = int_to_ptr.vmem [resolvable:$true] %s20_s10 }
   0x3   :  { %s142_s12 = smov 8  }
   0x4   :  { %26 = dma.hbm_to_vmem [thread:$0]  %s19_s8, 256, %s21_s10, [#allocation4], %s141_s11, %s141_s11, %s142_s12  }
   0x5   :  { %136 = dma.done.wait [#allocation4], 256  }
   0x6   :  { %137 = vsyncadd [#allocation4], 4294967040  ;;  %v40_v0 = vld [vmem:[#allocation3] sm:$0xff]  ;;  %v41_v1 = vld [vmem:[#allocation3 + $0x8] sm:$0xff]  ;;  %s143_s0 = smov [#allocation6]   ;;  %s68_s16 = sshll.u32 %s161_s1, 4  ;;  %s69_s16 = int_to_ptr.hbm [resolvable:$true] %s68_s16 }
   0x7   :  { %v42_v2 = vmul.f32 1.442695, %v40_v0  ;;  %v44_v3 = vmul.f32 1.442695, %v41_v1  ;;  %s66_s13 = sshll.u32 %s143_s0, 4  ;;  %s67_s13 = int_to_ptr.vmem [resolvable:$true] %s66_s13 }
   0x9   :  { %84 = vpow2.f32 %v42_v2 }
   0xa   :  { %86 = vpow2.f32 %v44_v3 }
   0xf   :  { %v85_v4 = vpop.eup %84 }
  0x10   :  { %v87_v5 = vpop.eup %86 }
  0x11   :  { %v47_v6 = vadd.f32 %v87_v5, %v85_v4 }
  0x13   :  { %v54_v7 = vrot.slane %v47_v6, 4 }
  0x15   :  { %v55_v8 = vadd.f32 %v54_v7, %v47_v6 }
  0x17   :  { %v56_v9 = vrot.slane %v55_v8, 2 }
  0x19   :  { %v57_v10 = vadd.f32 %v56_v9, %v55_v8 }
  0x1b   :  { %v58_v11 = vrot.slane %v57_v10, 1 }
  0x1d   :  { %v59_v12 = vadd.f32 %v58_v11, %v57_v10 }
  0x1f   :  { %60 = vst [vmem:[#allocation6] sm:$0x1] %v59_v12 }
  0x20   :  { %71 = dma.vmem_to_hbm [thread:$0]  %s67_s13, 16, %s69_s16, [#allocation5]  }
  0x21   :  { %138 = dma.done.wait [#allocation5], 16  }
  0x22   :  { %139 = vsyncadd [#allocation5], 4294967280 }
  0x23   :  { %76 = vsyncpa [#allocation4], 1 }
  0x24   :  { %77 = vsyncpa [#allocation5], 1 }

</bundles_post_ra>
